<compile_context>
chip_gen: v5e
topology: v5e:2x2
jax: 0.10.0
libtpu: 0.0.40
codegen_flags: <defaults>
</compile_context>

<pallas_src>
import functools

import jax
import jax.numpy as jnp
from jax.experimental import pallas as pl
from jax.experimental.pallas import tpu as pltpu


def _complex_linear_kernel(x_ref, w_ref, b_ref, o_ref, acc_ref):
    """One (tm, tk) x (tk, tn) MXU step with f32 accumulation over the K grid axis."""
    k = pl.program_id(2)

    @pl.when(k == 0)
    def _():
        acc_ref[...] = jnp.zeros_like(acc_ref)

    acc_ref[...] += jnp.dot(
        x_ref[...], w_ref[...], preferred_element_type=jnp.float32
    )

    @pl.when(k == pl.num_programs(2) - 1)
    def _():
        # Bias add fused into the epilogue; single lane-dense store.
        o_ref[...] = (acc_ref[...] + b_ref[...]).astype(o_ref.dtype)


def _round_up(x, m):
    return ((x + m - 1) // m) * m


@functools.partial(jax.jit, static_argnames=("tm", "tn", "tk"))
def complex_linear(x_real, x_imag, w_real, w_imag, b_real, b_imag,
                   *, tm=256, tn=256, tk=512):
    """x_*: (B, in) f32; w_*: (out, in) f32; b_*: (out,) f32 -> complex64 (B, out)."""
    B, in_size = x_real.shape
    out_size = w_real.shape[0]

    # ---- One-time packing glue (block-matrix form of the complex product) ----
    x_p = jnp.concatenate([x_real, x_imag], axis=1)               # (B, 2*in)
    wrT, wiT = w_real.T, w_imag.T                                 # (in, out)
    w_p = jnp.concatenate(
        [jnp.concatenate([wrT, wiT], axis=1),                     # (in, 2*out)
         jnp.concatenate([-wiT, wrT], axis=1)],                   # (in, 2*out)
        axis=0)                                                   # (2*in, 2*out)
    b_p = jnp.concatenate([b_real - b_imag, b_real + b_imag]).reshape(1, 2 * out_size)

    M, K = x_p.shape
    N = w_p.shape[1]

    # Adaptive tiles: keep (8, 128) alignment, shrink for small shapes.
    tm = min(tm, _round_up(M, 8))
    tn = min(tn, _round_up(N, 128))
    tk = min(tk, _round_up(K, 128))

    Mp, Kp, Np = _round_up(M, tm), _round_up(K, tk), _round_up(N, tn)
    if (Mp, Kp) != (M, K):
        x_p = jnp.pad(x_p, ((0, Mp - M), (0, Kp - K)))
    if (Kp, Np) != (K, N):
        w_p = jnp.pad(w_p, ((0, Kp - K), (0, Np - N)))
    if Np != N:
        b_p = jnp.pad(b_p, ((0, 0), (0, Np - N)))

    grid = (Mp // tm, Np // tn, Kp // tk)

    cost = pl.CostEstimate(
        flops=2 * Mp * Np * Kp,        # == 8*B*in*out when unpadded
        transcendentals=0,
        bytes_accessed=4 * (Mp * Kp + Kp * Np + Np + Mp * Np),
    )

    out_p = pl.pallas_call(
        _complex_linear_kernel,
        out_shape=jax.ShapeDtypeStruct((Mp, Np), jnp.float32),
        grid_spec=pltpu.PrefetchScalarGridSpec(
            num_scalar_prefetch=0,
            grid=grid,
            in_specs=[
                pl.BlockSpec((tm, tk), lambda i, j, k: (i, k)),   # activations
                pl.BlockSpec((tk, tn), lambda i, j, k: (k, j)),   # packed weights
                pl.BlockSpec((1, tn), lambda i, j, k: (0, j)),    # packed bias
            ],
            out_specs=pl.BlockSpec((tm, tn), lambda i, j, k: (i, j)),
            scratch_shapes=[pltpu.VMEM((tm, tn), jnp.float32)],
        ),
        compiler_params=pltpu.CompilerParams(
            dimension_semantics=("parallel", "parallel", "arbitrary"),
            vmem_limit_bytes=48 * 1024 * 1024,   # safe on v7x's 64 MiB physical VMEM
        ),
        cost_estimate=cost,
    )(x_p, w_p, b_p)

    out = out_p[:B, :N]                                           # drop padding
    return jax.lax.complex(out[:, :out_size], out[:, out_size:])  # glue: complex64 pack


if __name__ == "__main__":
    key = jax.random.PRNGKey(0)
    k_xr, k_xi, k_wr, k_wi, k_br, k_bi = jax.random.split(key, 6)

    B, in_size, out_size = 8, 32, 32

    # Deterministic inputs / parameters (PyTorch-like uniform(-1/sqrt(in), 1/sqrt(in))).
    bound = 1.0 / (in_size ** 0.5)
    x_real = jax.random.normal(k_xr, (B, in_size), dtype=jnp.float32)
    x_imag = jax.random.normal(k_xi, (B, in_size), dtype=jnp.float32)
    w_real = jax.random.uniform(k_wr, (out_size, in_size), jnp.float32, -bound, bound)
    w_imag = jax.random.uniform(k_wi, (out_size, in_size), jnp.float32, -bound, bound)
    b_real = jax.random.uniform(k_br, (out_size,), jnp.float32, -bound, bound)
    b_imag = jax.random.uniform(k_bi, (out_size,), jnp.float32, -bound, bound)

    out = complex_linear(x_real, x_imag, w_real, w_imag, b_real, b_imag)
    out = jax.block_until_ready(out)

    # Pure-JAX reference (matches the PyTorch module exactly).
    ref_real = (x_real @ w_real.T + b_real) - (x_imag @ w_imag.T + b_imag)
    ref_imag = (x_imag @ w_real.T + b_real) + (x_real @ w_imag.T + b_imag)
    ref = jax.lax.complex(ref_real, ref_imag)

    assert out.shape == (B, out_size) and out.dtype == jnp.complex64
    assert jnp.allclose(out, ref, atol=1e-5, rtol=1e-5)
    print("KERNEL_OK")
</pallas_src>

<mosaic_0001>
module attributes {stable_mosaic.version = 11 : i64} {
  func.func @_complex_linear_kernel(%arg0: i32, %arg1: i32, %arg2: i32, %arg3: memref<8x128xf32, #tpu.memory_space<vmem>>, %arg4: memref<128x128xf32, #tpu.memory_space<vmem>>, %arg5: memref<1x128xf32, #tpu.memory_space<vmem>>, %arg6: memref<8x128xf32, #tpu.memory_space<vmem>>, %arg7: memref<8x128xf32, #tpu.memory_space<vmem>>) attributes {dimension_semantics = [#tpu.dimension_semantics<parallel>, #tpu.dimension_semantics<parallel>, #tpu.dimension_semantics<arbitrary>], iteration_bounds = array<i64: 1, 1, 1>, scalar_prefetch = 0 : i64, scratch_operands = 1 : i64, tpu.core_type = #tpu.core_type<tc>, window_params = [{transform_indices = @transform_0, window_bounds = array<i64: 8, 128>}, {transform_indices = @transform_1, window_bounds = array<i64: 128, 128>}, {transform_indices = @transform_2, window_bounds = array<i64: 1, 128>}, {transform_indices = @transform_3, window_bounds = array<i64: 8, 128>}]} {
    %c0_i32 = arith.constant 0 : i32
    %0 = arith.cmpi eq, %arg2, %c0_i32 : i32
    %1 = arith.extui %0 : i1 to i32
    %c0_i32_0 = arith.constant 0 : i32
    %2 = arith.cmpi ne, %1, %c0_i32_0 : i32
    scf.if %2 {
      %cst_10 = arith.constant 0.000000e+00 : f32
      %12 = vector.broadcast %cst_10 : f32 to vector<8x128xf32>
      %c0_11 = arith.constant 0 : index
      %c0_12 = arith.constant 0 : index
      %13 = vector.load %arg7[%c0_11, %c0_12] : memref<8x128xf32, #tpu.memory_space<vmem>>, vector<8x128xf32>
      tpu.vector_store %arg7[%c0_11, %c0_12], %12 {strides = array<i32>} : memref<8x128xf32, #tpu.memory_space<vmem>>, vector<8x128xf32>,
    } else {
    }
    %c0 = arith.constant 0 : index
    %c0_1 = arith.constant 0 : index
    %3 = vector.load %arg7[%c0, %c0_1] : memref<8x128xf32, #tpu.memory_space<vmem>>, vector<8x128xf32>
    %c0_2 = arith.constant 0 : index
    %c0_3 = arith.constant 0 : index
    %4 = vector.load %arg3[%c0_2, %c0_3] : memref<8x128xf32, #tpu.memory_space<vmem>>, vector<8x128xf32>
    %c0_4 = arith.constant 0 : index
    %c0_5 = arith.constant 0 : index
    %5 = vector.load %arg4[%c0_4, %c0_5] : memref<128x128xf32, #tpu.memory_space<vmem>>, vector<128x128xf32>
    %cst = arith.constant dense<0.000000e+00> : vector<8x128xf32>
    %6 = tpu.matmul %4, %5, %cst {dimension_numbers = #tpu.dot_dimension_numbers<[1], [0], [0], [1], [0, 0, 1, 1], [], []>} : vector<8x128xf32>, vector<128x128xf32>, vector<8x128xf32> -> vector<8x128xf32>
    %7 = arith.addf %3, %6 : vector<8x128xf32>
    %c0_6 = arith.constant 0 : index
    %c0_7 = arith.constant 0 : index
    %8 = vector.load %arg7[%c0_6, %c0_7] : memref<8x128xf32, #tpu.memory_space<vmem>>, vector<8x128xf32>
    tpu.vector_store %arg7[%c0_6, %c0_7], %7 {strides = array<i32>} : memref<8x128xf32, #tpu.memory_space<vmem>>, vector<8x128xf32>,
    %c0_i32_8 = arith.constant 0 : i32
    %9 = arith.cmpi eq, %arg2, %c0_i32_8 : i32
    %10 = arith.extui %9 : i1 to i32
    %c0_i32_9 = arith.constant 0 : i32
    %11 = arith.cmpi ne, %10, %c0_i32_9 : i32
    scf.if %11 {
      %c0_10 = arith.constant 0 : index
      %c0_11 = arith.constant 0 : index
      %12 = vector.load %arg7[%c0_10, %c0_11] : memref<8x128xf32, #tpu.memory_space<vmem>>, vector<8x128xf32>
      %c0_12 = arith.constant 0 : index
      %c0_13 = arith.constant 0 : index
      %13 = vector.load %arg5[%c0_12, %c0_13] : memref<1x128xf32, #tpu.memory_space<vmem>>, vector<1x128xf32>
      %14 = vector.broadcast %13 : vector<1x128xf32> to vector<8x128xf32>
      %15 = arith.addf %12, %14 : vector<8x128xf32>
      %c0_14 = arith.constant 0 : index
      %c0_15 = arith.constant 0 : index
      %16 = vector.load %arg6[%c0_14, %c0_15] : memref<8x128xf32, #tpu.memory_space<vmem>>, vector<8x128xf32>
      tpu.vector_store %arg6[%c0_14, %c0_15], %15 {strides = array<i32>} : memref<8x128xf32, #tpu.memory_space<vmem>>, vector<8x128xf32>,
    } else {
    }
    return
  }
  func.func @transform_0(%arg0: i32, %arg1: i32, %arg2: i32) -> (i32, i32) {
    %c0_i32 = arith.constant 0 : i32
    return %arg0, %arg2 : i32, i32
  }
  func.func @transform_1(%arg0: i32, %arg1: i32, %arg2: i32) -> (i32, i32) {
    %c0_i32 = arith.constant 0 : i32
    return %arg2, %arg1 : i32, i32
  }
  func.func @transform_2(%arg0: i32, %arg1: i32, %arg2: i32) -> (i32, i32) {
    %c0_i32 = arith.constant 0 : i32
    %c0_i32_0 = arith.constant 0 : i32
    return %c0_i32, %arg1 : i32, i32
  }
  func.func @transform_3(%arg0: i32, %arg1: i32, %arg2: i32) -> (i32, i32) {
    %c0_i32 = arith.constant 0 : i32
    return %arg0, %arg1 : i32, i32
  }
}

</mosaic_0001>

<bundles_post_ra>
// kernel: custom-call
= control target key start
LH: loop header
LB: loop body
LE: loop exit
PB: predicated region body
PF: predicated region fallthrough
CT: control target
= control target key end

     0   :  { %s105_s0 = inlined_call_operand.vmem [shape: f32[8,32], index: 0, kind: input, shape index: {}]   ;;  %s106_s1 = inlined_call_operand.vmem [shape: f32[8,32], index: 1, kind: input, shape index: {}]   ;;  %s107_s2 = inlined_call_operand.hbm [shape: c64[8,32], index: 2, kind: output, shape index: {}]  }
   0x1   :  { %s3_s11 = scalar_lea.hbm %s107_s2, 8 }
   0x2   :  { %4 = vsyncpa [#allocation0], 0  ;;  %s6_s14 = sshll.u32 %s105_s0, 4  ;;  %s8_s17 = sshll.u32 %s107_s2, 4  ;;  %s7_s14 = int_to_ptr.vmem [resolvable:$true] %s6_s14  ;;  %s9_s17 = int_to_ptr.hbm [resolvable:$true] %s8_s17 }
   0x3   :  { %11 = dma.vmem_to_hbm [thread:$0]  %s7_s14, 128, %s9_s17, [#allocation0] }
   0x4   :  { %74 = dma.done.wait [#allocation0], 128  }
   0x5   :  { %75 = vsyncadd [#allocation0], 4294967168 }
   0x6   :  { %14 = vsyncpa [#allocation0], 1 }
   0x7   :  { %15 = vsyncpa [#allocation1], 0  ;;  %s17_s20 = sshll.u32 %s106_s1, 4  ;;  %s19_s21 = sshll.u32 %s3_s11, 4  ;;  %s18_s20 = int_to_ptr.vmem [resolvable:$true] %s17_s20  ;;  %s20_s21 = int_to_ptr.hbm [resolvable:$true] %s19_s21 }
   0x8   :  { %22 = dma.vmem_to_hbm [thread:$0]  %s18_s20, 128, %s20_s21, [#allocation1] }
   0x9   :  { %76 = dma.done.wait [#allocation1], 128  }
   0xa   :  { %77 = vsyncadd [#allocation1], 4294967168 }
   0xb   :  { %25 = vsyncpa [#allocation1], 1 }

// kernel: complex_linear.1
= control target key start
LH: loop header
LB: loop body
LE: loop exit
PB: predicated region body
PF: predicated region fallthrough
CT: control target
= control target key end

     0   :  { %s151_s1 = inlined_call_operand.vmem [shape: f32[128,128], index: 1, kind: input, shape index: {}]   ;;  %s152_s2 = inlined_call_operand.vmem [shape: f32[1,128], index: 2, kind: input, shape index: {}]   ;;  %s153_s0 = inlined_call_operand.vmem [shape: f32[8,128], index: 0, kind: input, shape index: {}]   ;;  %s154_s3 = inlined_call_operand.vmem [shape: f32[8,128], index: 3, kind: output, shape index: {}]  }
   0x1   :  { %v36_v0 = vld [vmem:[%s151_s1 + $0x78] sm:$0xff]  ;;  %v35_v1 = vld [vmem:[%s151_s1 + $0x70] sm:$0xff]  ;;  %v34_v2 = vld [vmem:[%s151_s1 + $0x68] sm:$0xff] }
   0x2   :  { %37 = vmatpush.msra.mxu0 %v36_v0  ;;  %v33_v3 = vld [vmem:[%s151_s1 + $0x60] sm:$0xff]  ;;  %v32_v4 = vld [vmem:[%s151_s1 + $0x58] sm:$0xff]  ;;  %v31_v5 = vld [vmem:[%s151_s1 + $0x50] sm:$0xff] }
   0x3   :  { %v30_v6 = vld [vmem:[%s151_s1 + $0x48] sm:$0xff]  ;;  %v29_v7 = vld [vmem:[%s151_s1 + $0x40] sm:$0xff]  ;;  %v28_v8 = vld [vmem:[%s151_s1 + $0x38] sm:$0xff] }
   0x4   :  { %38 = vmatpush.msra.mxu0 %v35_v1  ;;  %v27_v9 = vld [vmem:[%s151_s1 + $0x30] sm:$0xff]  ;;  %v26_v10 = vld [vmem:[%s151_s1 + $0x28] sm:$0xff]  ;;  %v25_v11 = vld [vmem:[%s151_s1 + $0x20] sm:$0xff] }
   0x5   :  { %v24_v12 = vld [vmem:[%s151_s1 + $0x18] sm:$0xff]  ;;  %v23_v13 = vld [vmem:[%s151_s1 + $0x10] sm:$0xff]  ;;  %v22_v14 = vld [vmem:[%s151_s1 + $0x8] sm:$0xff] }
   0x6   :  { %39 = vmatpush.msra.mxu0 %v34_v2  ;;  %v21_v15 = vld [vmem:[%s151_s1] sm:$0xff] }
   0x7   :  { %v20_v16 = vld [vmem:[%s153_s0] sm:$0xff] }
   0x8   :  { %40 = vmatpush.msra.mxu0 %v33_v3  ;;  %v73_v17 = vld [vmem:[%s152_s2] ss:$0 sm:$0xff] }
   0xa   :  { %41 = vmatpush.msra.mxu0 %v32_v4 }
   0xc   :  { %42 = vmatpush.msra.mxu0 %v31_v5 }
   0xe   :  { %43 = vmatpush.msra.mxu0 %v30_v6 }
  0x10   :  { %44 = vmatpush.msra.mxu0 %v29_v7 }
  0x12   :  { %45 = vmatpush.msra.mxu0 %v28_v8 }
  0x14   :  { %46 = vmatpush.msra.mxu0 %v27_v9 }
  0x16   :  { %47 = vmatpush.msra.mxu0 %v26_v10 }
  0x18   :  { %48 = vmatpush.msra.mxu0 %v25_v11 }
  0x1a   :  { %49 = vmatpush.msra.mxu0 %v24_v12 }
  0x1c   :  { %50 = vmatpush.msra.mxu0 %v23_v13 }
  0x1e   :  { %51 = vmatpush.msra.mxu0 %v22_v14 }
  0x20   :  { %52 = vmatpush.msra.mxu0 %v21_v15 }
  0x21   :  { %53 = vmatmul.f32.vlgmr.msra.gmra.mxu0 %v20_v16 }
  0x9e   :  { %v54_v18 = vpop.f32.mrf.mxu0 }
  0x9f   :  { %v67_v19 = vadd.f32 %v73_v17, %v54_v18 }
  0xa1   :  { %68 = vst [vmem:[%s154_s3] sm:$0xff] %v67_v19 }

</bundles_post_ra>
